<compile_context>
chip_gen: v6e
topology: v6e:2x2x1
jax: 0.10.0
libtpu: 0.0.40
codegen_flags: <defaults>
</compile_context>

<pallas_src>
import functools

import jax
import jax.numpy as jnp
from jax.experimental import pallas as pl
from jax.experimental.pallas import tpu as pltpu


def _fm_kernel(x_ref, o_ref, *, num_fields, embed_dim):
    # x_ref: (TB, F*D) block — batch on sublanes, flattened (field, embed) on lanes.
    # o_ref: (TB, 1)
    # Single pass over fields with two running f32 accumulators.
    x0 = x_ref[:, 0:embed_dim].astype(jnp.float32)
    s = x0                     # running sum over fields        (TB, D)
    sq = x0 * x0               # running sum of squares         (TB, D)
    for f in range(1, num_fields):                 # F is small & static -> unrolled
        lo = f * embed_dim
        xf = x_ref[:, lo:lo + embed_dim].astype(jnp.float32)
        s = s + xf
        sq = sq + xf * xf
    ix = s * s - sq                                          # (TB, D)
    o_ref[...] = (0.5 * jnp.sum(ix, axis=1, keepdims=True)).astype(o_ref.dtype)


def factorization_machine(x, reduce_sum=True, target_tile_bytes=8 << 20):
    """x: (batch, num_fields, embed_dim) -> (batch, 1)."""
    assert reduce_sum, "only reduce_sum=True path implemented in the kernel"
    B, F, D = x.shape
    itemsize = jnp.dtype(x.dtype).itemsize
    fd = F * D

    # Free relayout: row-major reshape, no extra HBM pass (unlike a transpose).
    x2 = x.reshape(B, fd)

    # Batch tile on the sublane axis: multiple of 8, ~8 MiB per input tile
    # (double-buffered -> ~16 MiB, well under the vmem limit below).
    row_bytes = max(1, fd * itemsize)
    tb = max(8, (target_tile_bytes // row_bytes) // 8 * 8)
    if B >= 16:
        # Guarantee >= 2 grid steps so the "parallel" axis can shard across
        # both TensorCores on v7x (and keeps pipelining alive elsewhere).
        tb = min(tb, max(8, (B // 2) // 8 * 8))
    if tb >= B:
        tb = B  # full-extent block: no sublane-divisibility requirement
    grid = (pl.cdiv(B, tb),)
    # Edge block (B % tb != 0): OOB rows compute garbage that is never written
    # back (per-row independence), so no explicit padding pass is needed.

    kernel = functools.partial(_fm_kernel, num_fields=F, embed_dim=D)
    out = pl.pallas_call(
        kernel,
        out_shape=jax.ShapeDtypeStruct((B, 1), x.dtype),
        grid=grid,
        in_specs=[pl.BlockSpec((tb, fd), lambda i: (i, 0))],
        out_specs=pl.BlockSpec((tb, 1), lambda i: (i, 0)),
        compiler_params=pltpu.CompilerParams(
            dimension_semantics=("parallel",),
            vmem_limit_bytes=48 << 20,   # headroom on v5e/v6e/v7x
        ),
        cost_estimate=pl.CostEstimate(
            flops=3 * B * F * D,
            transcendentals=0,
            bytes_accessed=B * F * D * itemsize + B * itemsize,
        ),
    )(x2)

    return out


def _fm_ref(x):
    square_of_sum = jnp.sum(x, axis=1) ** 2
    sum_of_square = jnp.sum(x ** 2, axis=1)
    ix = square_of_sum - sum_of_square
    ix = jnp.sum(ix, axis=1, keepdims=True)
    return 0.5 * ix


if __name__ == "__main__":
    key = jax.random.PRNGKey(0)
    B, F, D = 2, 4, 16  # (batch_size, num_fields, embed_dim)
    x = jax.random.normal(key, (B, F, D), dtype=jnp.float32)

    out = factorization_machine(x)
    out = jax.block_until_ready(out)

    ref = _fm_ref(x)
    assert out.shape == (B, 1), out.shape
    assert jnp.allclose(out, ref, atol=1e-4, rtol=1e-4), (out, ref)
    print("KERNEL_OK")
</pallas_src>

<mosaic_0001>
module attributes {stable_mosaic.version = 11 : i64} {
  func.func @_fm_kernel(%arg0: i32, %arg1: memref<2x64xf32, #tpu.memory_space<vmem>>, %arg2: memref<2x1xf32, #tpu.memory_space<vmem>>) attributes {dimension_semantics = [#tpu.dimension_semantics<parallel>], iteration_bounds = array<i64: 1>, scalar_prefetch = 0 : i64, scratch_operands = 0 : i64, tpu.core_type = #tpu.core_type<tc>, window_params = [{transform_indices = @transform_0, window_bounds = array<i64: 2, 64>}, {transform_indices = @transform_1, window_bounds = array<i64: 2, 1>}]} {
    %c0 = arith.constant 0 : index
    %c0_0 = arith.constant 0 : index
    %0 = vector.load %arg1[%c0, %c0_0] : memref<2x64xf32, #tpu.memory_space<vmem>>, vector<2x16xf32>
    %1 = arith.mulf %0, %0 : vector<2x16xf32>
    %c0_1 = arith.constant 0 : index
    %c16 = arith.constant 16 : index
    %2 = vector.load %arg1[%c0_1, %c16] : memref<2x64xf32, #tpu.memory_space<vmem>>, vector<2x16xf32>
    %3 = arith.addf %0, %2 : vector<2x16xf32>
    %4 = arith.mulf %2, %2 : vector<2x16xf32>
    %5 = arith.addf %1, %4 : vector<2x16xf32>
    %c0_2 = arith.constant 0 : index
    %c32 = arith.constant 32 : index
    %6 = vector.load %arg1[%c0_2, %c32] : memref<2x64xf32, #tpu.memory_space<vmem>>, vector<2x16xf32>
    %7 = arith.addf %3, %6 : vector<2x16xf32>
    %8 = arith.mulf %6, %6 : vector<2x16xf32>
    %9 = arith.addf %5, %8 : vector<2x16xf32>
    %c0_3 = arith.constant 0 : index
    %c48 = arith.constant 48 : index
    %10 = vector.load %arg1[%c0_3, %c48] : memref<2x64xf32, #tpu.memory_space<vmem>>, vector<2x16xf32>
    %11 = arith.addf %7, %10 : vector<2x16xf32>
    %12 = arith.mulf %10, %10 : vector<2x16xf32>
    %13 = arith.addf %9, %12 : vector<2x16xf32>
    %14 = arith.mulf %11, %11 : vector<2x16xf32>
    %15 = arith.subf %14, %13 : vector<2x16xf32>
    %cst = arith.constant dense<0.000000e+00> : vector<2xf32>
    %16 = vector.multi_reduction <add>, %15, %cst [1] : vector<2x16xf32> to vector<2xf32>
    %17 = vector.shape_cast %16 : vector<2xf32> to vector<2x1xf32>
    %cst_4 = arith.constant 5.000000e-01 : f32
    %18 = vector.broadcast %cst_4 : f32 to vector<2x1xf32>
    %19 = arith.mulf %18, %17 : vector<2x1xf32>
    %c0_5 = arith.constant 0 : index
    %c0_6 = arith.constant 0 : index
    %20 = vector.load %arg2[%c0_5, %c0_6] : memref<2x1xf32, #tpu.memory_space<vmem>>, vector<2x1xf32>
    tpu.vector_store %arg2[%c0_5, %c0_6], %19 {strides = array<i32>} : memref<2x1xf32, #tpu.memory_space<vmem>>, vector<2x1xf32>,
    return
  }
  func.func @transform_0(%arg0: i32) -> (i32, i32) {
    %c0_i32 = arith.constant 0 : i32
    %c0_i32_0 = arith.constant 0 : i32
    return %arg0, %c0_i32 : i32, i32
  }
  func.func @transform_1(%arg0: i32) -> (i32, i32) {
    %c0_i32 = arith.constant 0 : i32
    %c0_i32_0 = arith.constant 0 : i32
    return %arg0, %c0_i32 : i32, i32
  }
}

</mosaic_0001>

<bundles_post_ra>
// kernel: tpu_custom_call.1
= control target key start
LH: loop header
LB: loop body
LE: loop exit
PB: predicated region body
PF: predicated region fallthrough
CT: control target
= control target key end

     0   :  { %6 = vsyncpa [#allocation3], 0  ;;  %s88_s6 = smov [#allocation2]   ;;  %s108_s0 = inlined_call_operand.hbm [shape: f32[2,64], index: 0, kind: input, shape index: {}]   ;;  %s109_s1 = inlined_call_operand.vmem [shape: f32[2,1], index: 1, kind: output, shape index: {}]  }
   0x1   :  { %s13_s7 = sshll.u32 %s88_s6, 4  ;;  %s14_s7 = int_to_ptr.vmem [resolvable:$true] %s13_s7 }
   0x2   :  { %s74_s8 = scalar_lea.vmem %s14_s7, 32  ;;  %p79_p1 = scmp.lt.s32.totalorder %s14_s7, %s14_s7 }
   0x3   :  { %p75_p0 = scmp.ne.s32.totalorder %s14_s7, %s74_s8  ;;  %p80_p2 = scmp.lt.s32.totalorder %s74_s8, %s74_s8 }
   0x5   :  { %p81_p3 = por %p80_p2, %p79_p1 }
   0x7   :  { %p82_p4 = pnand %p81_p3, %p75_p0 }
   0x9   :  { %85 = shalt.err (!%p82_p4)
}
   0xa   :  { %16 = dma.hbm_to_vmem [thread:$0]  %s108_s0, 32, %s14_s7, [#allocation3]  }
   0xb   :  { %86 = dma.done.wait [#allocation3], 32  }
   0xc   :  { %87 = vsyncadd [#allocation3], 4294967264  ;;  %v20_v0 = vld [vmem:[#allocation2] sm:$0x3]  ;;  %s89_s11 = smov 96   ;;  %s90_s12 = smov 112  }
   0xd   :  { %32 = vrot.lane.b32.xlu1 %v20_v0, %s89_s11  ;;  %23 = vrot.lane.b32.xlu0 %v20_v0, %s90_s12  ;;  %v21_v1 = vmul.f32 %v20_v0, %v20_v0  ;;  %s91_s13 = smov 80   ;;  %vm50_vm0 = vcmask 123904   ;;  %vm55_vm1 = vcmask 1024  }
  0x11   :  { %36 = vrot.lane.b32.xlu1 %v21_v1, %s89_s11  ;;  %28 = vrot.lane.b32.xlu0 %v21_v1, %s90_s12 }
  0x15   :  { %44 = vrot.lane.b32.xlu1 %v21_v1, %s91_s13  ;;  %40 = vrot.lane.b32.xlu0 %v20_v0, %s91_s13 }
  0x7f   :  { %v33_v2 = vpop.permute.xlu1 %32  ;;  %v24_v3 = vpop.permute.xlu0 %23 }
  0x80   :  { %v26_v4 = vadd.f32 %v24_v3, %v20_v0 }
  0x82   :  { %v35_v9 = vadd.f32 %v33_v2, %v26_v4 }
  0x83   :  { %v37_v5 = vpop.permute.xlu1 %36  ;;  %v29_v6 = vpop.permute.xlu0 %28 }
  0x84   :  { %v31_v7 = vadd.f32 %v29_v6, %v21_v1 }
  0x86   :  { %v39_v8 = vadd.f32 %v37_v5, %v31_v7 }
  0x87   :  { %v45_v10 = vpop.permute.xlu1 %44  ;;  %v41_v11 = vpop.permute.xlu0 %40 }
  0x88   :  { %v43_v12 = vadd.f32 %v41_v11, %v35_v9  ;;  %v47_v13 = vadd.f32 %v45_v10, %v39_v8 }
  0x8a   :  { %v48_v14 = vmul.f32 %v43_v12, %v43_v12 }
  0x8c   :  { %v49_v15 = vsub.f32 %v48_v14, %v47_v13 }
  0x8e   :  { %v51_v16 = vsel %vm50_vm0, %v49_v15, 0.0 }
  0x8f   :  { %52 = vadd.xlane.f32.xlu0 %v51_v16 }
 0x118   :  { %v53_v17 = vpop.xlane.xlu0 %52 }
 0x119   :  { %v54_v18 = vmul.f32 0.5, %v53_v17 }
 0x11b   :  { %56 = vst.msk [vmem:[%s109_s1] sm:$0x3] %vm55_vm1, %v54_v18 }
 0x11c   :  { %61 = vsyncpa [#allocation3], 1 }

</bundles_post_ra>
